<compile_context>
chip_gen: v6e
topology: v6e:2x2x1
jax: 0.10.0
libtpu: 0.0.40
codegen_flags: <defaults>
</compile_context>

<pallas_src>
import functools

import jax
import jax.numpy as jnp
import numpy as np
from jax.experimental import pallas as pl
from jax.experimental.pallas import tpu as pltpu

EPS = 1e-5  # DEFAULT_LAYER_NORM_EPS


# --------------------------------------------------------------------------------------
# Shared in-kernel helpers
# --------------------------------------------------------------------------------------
def _weird_layernorm_2d(z):
    """Reproduces LayerNormalization.forward for one batch element (T, C).

    torch: xmean = x.mean(dim=1)  -> mean over T
           xvar  = x.var(dim=2, unbiased=True) -> var over C (its own mean, /(C-1))
    gamma=1, beta=0 -> identity affine.
    """
    C = z.shape[1]
    zmean_t = jnp.mean(z, axis=0, keepdims=True)                           # (1, C) mean over T
    zmean_c = jnp.mean(z, axis=1, keepdims=True)                           # (T, 1) mean over C
    zvar_c = jnp.sum((z - zmean_c) ** 2, axis=1, keepdims=True) * (1.0 / (C - 1))
    return (z - zmean_t) * jax.lax.rsqrt(zvar_c + EPS)                     # rsqrt -> EUP


# --------------------------------------------------------------------------------------
# Kernel 1: token embedding gather (one-hot MXU matmul) + position embedding add
# --------------------------------------------------------------------------------------
def embed_kernel(idx_ref, tok_ref, pos_ref, o_ref, *, vocab_size):
    idx_col = idx_ref[0]                                                   # (T, 1) int32
    T = idx_col.shape[0]
    onehot = (jax.lax.broadcasted_iota(jnp.int32, (T, vocab_size), 1) == idx_col
              ).astype(jnp.float32)                                        # (T, V)
    tok = jnp.dot(onehot, tok_ref[...], preferred_element_type=jnp.float32)  # (T, C) gather
    o_ref[0] = tok + pos_ref[...]


def embed(idx, tok_table, pos_table):
    B, T = idx.shape
    V, C = tok_table.shape
    kernel = functools.partial(embed_kernel, vocab_size=V)
    return pl.pallas_call(
        kernel,
        out_shape=jax.ShapeDtypeStruct((B, T, C), jnp.float32),
        grid=(B,),
        in_specs=[
            pl.BlockSpec((1, T, 1), lambda b: (b, 0, 0)),                  # idx as column vec
            pl.BlockSpec((V, C), lambda b: (0, 0)),                        # token table
            pl.BlockSpec((T, C), lambda b: (0, 0)),                        # position table
        ],
        out_specs=pl.BlockSpec((1, T, C), lambda b: (b, 0, 0)),
        compiler_params=pltpu.CompilerParams(dimension_semantics=("parallel",)),
    )(idx.reshape(B, T, 1), tok_table, pos_table)


# --------------------------------------------------------------------------------------
# Kernel 2: AttentionBlock (pre-LN-ish block with the "weird" LayerNorm)
# --------------------------------------------------------------------------------------
def attention_block_kernel(x_ref, wqkv_ref, wproj_ref, bproj_ref,
                           wff1_ref, bff1_ref, wff2_ref, bff2_ref,
                           o_ref, *, num_heads):
    x = x_ref[0]                                   # (T, C) f32
    T, C = x.shape
    D = C // num_heads

    # Causal mask built in-kernel (no tril HBM input).
    row = jax.lax.broadcasted_iota(jnp.int32, (T, T), 0)
    col = jax.lax.broadcasted_iota(jnp.int32, (T, T), 1)
    causal = row >= col

    # --- self-attention branch: x + proj(concat_h(softmax(q k^T) v)) ---
    ln1 = _weird_layernorm_2d(x)
    # Fused QKV projection; the C**-0.5 scale is pre-folded into the Q columns of wqkv.
    qkv = jnp.dot(ln1.astype(jnp.bfloat16), wqkv_ref[...],
                  preferred_element_type=jnp.float32)                      # (T, 3C)

    heads = []
    for h in range(num_heads):                     # unrolled at trace time (num_heads small)
        q = qkv[:, h * D:(h + 1) * D].astype(jnp.bfloat16)                 # (T, D)
        k = qkv[:, C + h * D:C + (h + 1) * D].astype(jnp.bfloat16)         # (T, D)
        v = qkv[:, 2 * C + h * D:2 * C + (h + 1) * D].astype(jnp.bfloat16)  # (T, D)
        wei = jnp.dot(q, k.T, preferred_element_type=jnp.float32)          # (T, T), scale folded
        wei = jnp.where(causal, wei, -jnp.inf)                             # causal mask
        wei = wei - jnp.max(wei, axis=-1, keepdims=True)
        e = jnp.exp(wei)
        p = e * pl.reciprocal(jnp.sum(e, axis=-1, keepdims=True), approx=True)
        heads.append(jnp.dot(p.astype(jnp.bfloat16), v,
                             preferred_element_type=jnp.float32))          # (T, D)
    cat = jnp.concatenate(heads, axis=-1)          # (T, C) lane-dense slab
    sa = jnp.dot(cat.astype(jnp.bfloat16), wproj_ref[...],
                 preferred_element_type=jnp.float32) + bproj_ref[...]      # single out-proj
    # TODO(synk): MultiHead/Head dropout skipped (eval-mode identity).
    x1 = x + sa

    # --- feed-forward branch: x1 + W2 @ relu(W1 @ ln2(x1)) ---
    ln2 = _weird_layernorm_2d(x1).astype(jnp.bfloat16)
    h1 = jnp.dot(ln2, wff1_ref[...], preferred_element_type=jnp.float32) + bff1_ref[...]
    h1 = jnp.maximum(h1, 0.0).astype(jnp.bfloat16)
    ff = jnp.dot(h1, wff2_ref[...], preferred_element_type=jnp.float32) + bff2_ref[...]
    # TODO(synk): FeedForward dropout skipped (eval-mode identity).
    o_ref[0] = x1 + ff


def attention_block(x, blk_params, *, num_heads):
    B, T, C = x.shape
    F4 = 4 * C
    wqkv, wproj, bproj, wff1, bff1, wff2, bff2 = blk_params
    kernel = functools.partial(attention_block_kernel, num_heads=num_heads)
    return pl.pallas_call(
        kernel,
        out_shape=jax.ShapeDtypeStruct((B, T, C), x.dtype),
        grid=(B,),
        in_specs=[
            pl.BlockSpec((1, T, C), lambda b: (b, 0, 0)),                  # x (per-batch tile)
            pl.BlockSpec((C, 3 * C), lambda b: (0, 0)),                    # fused Wqkv (bf16)
            pl.BlockSpec((C, C), lambda b: (0, 0)),                        # Wproj (bf16)
            pl.BlockSpec((1, C), lambda b: (0, 0)),                        # bproj (f32)
            pl.BlockSpec((C, F4), lambda b: (0, 0)),                       # Wff1 (bf16)
            pl.BlockSpec((1, F4), lambda b: (0, 0)),                       # bff1 (f32)
            pl.BlockSpec((F4, C), lambda b: (0, 0)),                       # Wff2 (bf16)
            pl.BlockSpec((1, C), lambda b: (0, 0)),                        # bff2 (f32)
        ],
        out_specs=pl.BlockSpec((1, T, C), lambda b: (b, 0, 0)),
        compiler_params=pltpu.CompilerParams(dimension_semantics=("parallel",)),
    )(x, wqkv, wproj, bproj, wff1, bff1, wff2, bff2)


# --------------------------------------------------------------------------------------
# Kernel 3: final weird LayerNorm + lm_head (lane-dense V=128 logits)
# --------------------------------------------------------------------------------------
def final_kernel(x_ref, wlm_ref, blm_ref, o_ref):
    x = x_ref[0]                                   # (T, C)
    lnf = _weird_layernorm_2d(x).astype(jnp.bfloat16)
    o_ref[0] = jnp.dot(lnf, wlm_ref[...], preferred_element_type=jnp.float32) + blm_ref[...]


def lm_head(x, wlm, blm):
    B, T, C = x.shape
    V = wlm.shape[1]
    return pl.pallas_call(
        final_kernel,
        out_shape=jax.ShapeDtypeStruct((B, T, V), jnp.float32),
        grid=(B,),
        in_specs=[
            pl.BlockSpec((1, T, C), lambda b: (b, 0, 0)),
            pl.BlockSpec((C, V), lambda b: (0, 0)),
            pl.BlockSpec((1, V), lambda b: (0, 0)),
        ],
        out_specs=pl.BlockSpec((1, T, V), lambda b: (b, 0, 0)),
        compiler_params=pltpu.CompilerParams(dimension_semantics=("parallel",)),
    )(x, wlm, blm)


# --------------------------------------------------------------------------------------
# Full model forward (logits only; targets=None path of BigramLanguageModel.forward)
# --------------------------------------------------------------------------------------
def bigram_lm_forward(idx, packed_params, *, num_heads):
    tok_table, pos_table, blocks, wlm, blm = packed_params
    x = embed(idx, tok_table, pos_table)
    for blk in blocks:
        x = attention_block(x, blk, num_heads=num_heads)
    return lm_head(x, wlm, blm)


def pack_block_params(wq, wk, wv, wproj, bproj, wff1, bff1, wff2, bff2, *, embed_dim):
    """Fuse per-head Q/K/V weights into one (C, 3C) bf16 matrix, fold the C**-0.5 scale
    into the Q columns, and cast all matmul weights to bf16 (biases stay f32)."""
    H = wq.shape[0]
    scale = embed_dim ** (-0.5)    # NOTE: PyTorch Head scales by embed_dim**-0.5, not head_size
    wq_cat = jnp.concatenate([wq[h] for h in range(H)], axis=1) * scale    # (C, C)
    wk_cat = jnp.concatenate([wk[h] for h in range(H)], axis=1)            # (C, C)
    wv_cat = jnp.concatenate([wv[h] for h in range(H)], axis=1)            # (C, C)
    wqkv = jnp.concatenate([wq_cat, wk_cat, wv_cat], axis=1).astype(jnp.bfloat16)  # (C, 3C)
    return (wqkv, wproj.astype(jnp.bfloat16), bproj,
            wff1.astype(jnp.bfloat16), bff1, wff2.astype(jnp.bfloat16), bff2)


# --------------------------------------------------------------------------------------
# Pure-JAX f32 mirror of the PyTorch forward (eval mode) for correctness checking.
# --------------------------------------------------------------------------------------
def reference(idx, raw_params, *, num_heads):
    tok_table, pos_table, blocks, wlm, blm = raw_params
    B, T = idx.shape

    def ln(z):
        zmean = z.mean(axis=1, keepdims=True)                 # torch dim=1 (T)
        zvar = z.var(axis=2, keepdims=True, ddof=1)           # torch dim=2 (C), unbiased
        return (z - zmean) / jnp.sqrt(zvar + EPS)

    x = tok_table[idx] + pos_table[:T]
    C = x.shape[-1]
    mask = jnp.tril(jnp.ones((T, T), bool))
    for (wq, wk, wv, wproj, bproj, wff1, bff1, wff2, bff2) in blocks:
        ln1 = ln(x)
        outs = []
        for h in range(num_heads):
            q = ln1 @ wq[h]
            k = ln1 @ wk[h]
            v = ln1 @ wv[h]
            wei = jnp.einsum('btd,bsd->bts', q, k) * C ** (-0.5)
            wei = jnp.where(mask, wei, -jnp.inf)
            wei = jax.nn.softmax(wei, axis=-1)
            outs.append(jnp.einsum('bts,bsd->btd', wei, v))
        x = x + (jnp.concatenate(outs, axis=-1) @ wproj + bproj)
        ln2 = ln(x)
        x = x + (jnp.maximum(ln2 @ wff1 + bff1, 0.0) @ wff2 + bff2)
    return ln(x) @ wlm + blm


if __name__ == "__main__":
    # Small shapes consistent with the module: B=2, T=block_dim=8, C=embed_dim=32,
    # 4 heads, vocab_size=128 (lane-dense logits), 2 attention blocks for the demo.
    B, T, C, H = 2, 8, 32, 4
    V = 128
    L = 2                      # num_attention_blocks kept tiny for the demo
    F4 = 4 * C

    key = jax.random.PRNGKey(0)
    k_idx, k_tok, k_pos, k_lm, k_blm, key = jax.random.split(key, 6)

    idx = jax.random.randint(k_idx, (B, T), 0, V, dtype=jnp.int32)
    tok_table = jax.random.normal(k_tok, (V, C), jnp.float32)
    pos_table = jax.random.normal(k_pos, (T, C), jnp.float32)
    wlm = jax.random.normal(k_lm, (C, V), jnp.float32) * 0.05
    blm = jax.random.normal(k_blm, (1, V), jnp.float32) * 0.05

    raw_blocks = []
    for layer in range(L):
        ks = jax.random.split(jax.random.fold_in(key, layer), 9)
        wq = jax.random.normal(ks[0], (H, C, C // H), jnp.float32) * 0.05
        wk = jax.random.normal(ks[1], (H, C, C // H), jnp.float32) * 0.05
        wv = jax.random.normal(ks[2], (H, C, C // H), jnp.float32) * 0.05
        wproj = jax.random.normal(ks[3], (C, C), jnp.float32) * 0.05
        bproj = jax.random.normal(ks[4], (1, C), jnp.float32) * 0.05
        wff1 = jax.random.normal(ks[5], (C, F4), jnp.float32) * 0.05
        bff1 = jax.random.normal(ks[6], (1, F4), jnp.float32) * 0.05
        wff2 = jax.random.normal(ks[7], (F4, C), jnp.float32) * 0.05
        bff2 = jax.random.normal(ks[8], (1, C), jnp.float32) * 0.05
        raw_blocks.append((wq, wk, wv, wproj, bproj, wff1, bff1, wff2, bff2))

    packed_blocks = [pack_block_params(*blk, embed_dim=C) for blk in raw_blocks]
    packed_params = (tok_table, pos_table, packed_blocks, wlm.astype(jnp.bfloat16), blm)

    logits = bigram_lm_forward(idx, packed_params, num_heads=H)
    logits = jax.block_until_ready(logits)

    ref = reference(idx, (tok_table, pos_table, raw_blocks, wlm, blm), num_heads=H)
    # Tolerance loosened vs the f32 version because matmuls now use the bf16 MXU path
    # and the softmax denominator uses the approximate EUP reciprocal.
    np.testing.assert_allclose(np.asarray(logits), np.asarray(ref), rtol=3e-2, atol=3e-2)

    print("KERNEL_OK")
</pallas_src>

<mosaic_0001>
module attributes {stable_mosaic.version = 11 : i64} {
  func.func @embed_kernel(%arg0: i32, %arg1: memref<1x8x1xi32, #tpu.memory_space<vmem>>, %arg2: memref<128x32xf32, #tpu.memory_space<vmem>>, %arg3: memref<8x32xf32, #tpu.memory_space<vmem>>, %arg4: memref<1x8x32xf32, #tpu.memory_space<vmem>>) attributes {dimension_semantics = [#tpu.dimension_semantics<parallel>], iteration_bounds = array<i64: 2>, scalar_prefetch = 0 : i64, scratch_operands = 0 : i64, tpu.core_type = #tpu.core_type<tc>, window_params = [{transform_indices = @transform_0, window_bounds = array<i64: 1, 8, 1>}, {pipeline_mode = #tpu.pipeline_mode<synchronous>, transform_indices = @transform_1, window_bounds = array<i64: 128, 32>}, {pipeline_mode = #tpu.pipeline_mode<synchronous>, transform_indices = @transform_2, window_bounds = array<i64: 8, 32>}, {transform_indices = @transform_3, window_bounds = array<i64: 1, 8, 32>}]} {
    %c0 = arith.constant 0 : index
    %c0_0 = arith.constant 0 : index
    %c0_1 = arith.constant 0 : index
    %0 = vector.load %arg1[%c0, %c0_0, %c0_1] : memref<1x8x1xi32, #tpu.memory_space<vmem>>, vector<1x8x1xi32>
    %1 = vector.shape_cast %0 : vector<1x8x1xi32> to vector<8x1xi32>
    %2 = tpu.iota {dimensions = array<i32: 1>} : vector<8x128xi32>
    %3 = vector.broadcast %1 : vector<8x1xi32> to vector<8x128xi32>
    %4 = arith.cmpi eq, %2, %3 : vector<8x128xi32>
    %5 = arith.extui %4 : vector<8x128xi1> to vector<8x128xi32>
    %6 = arith.sitofp %5 : vector<8x128xi32> to vector<8x128xf32>
    %c0_2 = arith.constant 0 : index
    %c0_3 = arith.constant 0 : index
    %7 = vector.load %arg2[%c0_2, %c0_3] : memref<128x32xf32, #tpu.memory_space<vmem>>, vector<128x32xf32>
    %cst = arith.constant dense<0.000000e+00> : vector<8x32xf32>
    %8 = tpu.matmul %6, %7, %cst {dimension_numbers = #tpu.dot_dimension_numbers<[1], [0], [0], [1], [0, 0, 1, 1], [], []>} : vector<8x128xf32>, vector<128x32xf32>, vector<8x32xf32> -> vector<8x32xf32>
    %c0_4 = arith.constant 0 : index
    %c0_5 = arith.constant 0 : index
    %9 = vector.load %arg3[%c0_4, %c0_5] : memref<8x32xf32, #tpu.memory_space<vmem>>, vector<8x32xf32>
    %10 = arith.addf %8, %9 : vector<8x32xf32>
    %c0_6 = arith.constant 0 : index
    %c0_7 = arith.constant 0 : index
    %c0_8 = arith.constant 0 : index
    %11 = vector.load %arg4[%c0_6, %c0_7, %c0_8] : memref<1x8x32xf32, #tpu.memory_space<vmem>>, vector<1x8x32xf32>
    %12 = vector.shape_cast %11 : vector<1x8x32xf32> to vector<8x32xf32>
    %13 = vector.shape_cast %10 : vector<8x32xf32> to vector<1x8x32xf32>
    tpu.vector_store %arg4[%c0_6, %c0_7, %c0_8], %13 {strides = array<i32>} : memref<1x8x32xf32, #tpu.memory_space<vmem>>, vector<1x8x32xf32>,
    return
  }
  func.func @transform_0(%arg0: i32) -> (i32, i32, i32) {
    %c0_i32 = arith.constant 0 : i32
    %c0_i32_0 = arith.constant 0 : i32
    %c0_i32_1 = arith.constant 0 : i32
    return %arg0, %c0_i32, %c0_i32_0 : i32, i32, i32
  }
  func.func @transform_1(%arg0: i32) -> (i32, i32) {
    %c0_i32 = arith.constant 0 : i32
    %c0_i32_0 = arith.constant 0 : i32
    %c0_i32_1 = arith.constant 0 : i32
    return %c0_i32, %c0_i32_0 : i32, i32
  }
  func.func @transform_2(%arg0: i32) -> (i32, i32) {
    %c0_i32 = arith.constant 0 : i32
    %c0_i32_0 = arith.constant 0 : i32
    %c0_i32_1 = arith.constant 0 : i32
    return %c0_i32, %c0_i32_0 : i32, i32
  }
  func.func @transform_3(%arg0: i32) -> (i32, i32, i32) {
    %c0_i32 = arith.constant 0 : i32
    %c0_i32_0 = arith.constant 0 : i32
    %c0_i32_1 = arith.constant 0 : i32
    return %arg0, %c0_i32, %c0_i32_0 : i32, i32, i32
  }
}

</mosaic_0001>

<bundles_post_ra>
// kernel: tpu_custom_call.1
= control target key start
LH: loop header
LB: loop body
LE: loop exit
PB: predicated region body
PF: predicated region fallthrough
CT: control target
= control target key end

     0   :  { %8 = vsyncpa [#allocation3], 0  ;;  %s676_s0 = inlined_call_operand.vmem [shape: s32[2,8,1], index: 0, kind: input, shape index: {}]   ;;  %s677_s1 = inlined_call_operand.vmem [shape: f32[128,32], index: 1, kind: input, shape index: {}]   ;;  %s678_s2 = inlined_call_operand.vmem [shape: f32[8,32], index: 2, kind: input, shape index: {}]   ;;  %s679_s3 = inlined_call_operand.hbm [shape: f32[2,8,32], index: 3, kind: output, shape index: {}]  }
   0x1   :  { %10 = vsyncpa [#allocation3 + $0x1], 0  ;;  %s532_s12 = smov 0   ;;  %s534_s13 = smov 0  }
   0x2   :  { %s536_s14 = smov 0   ;;  %s538_s15 = smov 0  }
   0x3 LB: > { %s553_s16 = sadd.s32 4294967295, %s505_s15   ;;  %s337_s17 = sadd.s32 4294967294, %s505_s15   ;;  %s505_s15 = sphi %s538_s15, %s685_s15   ;;  %s501_s14 = sphi %s536_s14, %s684_s14   ;;  %s497_s13 = sphi %s534_s13, %s683_s13   ;;  %s493_s12 = sphi %s532_s12, %s682_s12  }
   0x4   : > { %s557_s18 = sadd.s32 1, %s505_s15   ;;  %s91_s19 = sadd.s32 1, %s501_s14 }
   0x5   : > { %s88_s20 = ssub.s32 %s505_s15, %s557_s18  ;;  %p101_p0 = scmp.ne.s32.totalorder %s501_s14, %s497_s13 }
   0x6   : > { %p89_p1 = scmp.eq.s32.totalorder %s88_s20, 0  ;;  %p102_p2 = scmp.eq.s32.totalorder %s553_s16, 1 }
   0x7   : > { %p107_p3 = scmp.ne.s32.totalorder %s497_s13, %s493_s12  ;;  %p108_p4 = scmp.eq.s32.totalorder %s337_s17, 1 }
   0x8   : > { %s568_s21 = scalar_select %p89_p1, %s501_s14, %s91_s19  }
   0x9   : > { %p570_p5 = por %p102_p2, %p101_p0  ;;  %p574_p6 = por %p108_p4, %p107_p3 }
   0xa   : > { %p340_p7 = scmp.ge.s32.totalorder %s505_s15, 1  ;;  %p139_p8 = scmp.lt.s32.totalorder %s505_s15, 3 }
   0xc   : > { %p140_p9 = pnand %p340_p7, %p139_p8 }
   0xd   : > { %p162_p10 = scmp.lt.s32.totalorder (!%p140_p9), %s553_s16, 1  ;;  %s159_s25 = sand.u32 (!%p140_p9), 1, %s497_s13  }
   0xe   : > { %143 = sbr.rel (%p140_p9) target bundleno = 357 (0x165), region = 32  ;;  %s341_s26 = sshll.u32 (!%p140_p9), %s159_s25, 3 }
   0xf   : > { %s346_s29 = sshll.u32 (!%p140_p9), %s553_s16, 7  ;;  %s161_s30 = scalar_lea.vmem (!%p140_p9), [#allocation2], %s341_s26 }
  0x10   : > { %s265_s8 = scalar_lea.sflag (!%p140_p9), [#allocation3], %s159_s25 }
  0x13   : > { %v190_v0 = vld [vmem:[%s677_s1 + $0x78] sm:$0xff]  ;;  %v507_v1 = vmov 0   ;;  %v508_v2 = vmov 0.0   ;;  %v189_v3 = vld [vmem:[%s677_s1 + $0x70] sm:$0xff]  ;;  %s163_s28 = scalar_select %p162_p10, %s553_s16, 1  ;;  %v188_v4 = vld [vmem:[%s677_s1 + $0x68] sm:$0xff]  ;;  %v167_v19 = vlaneseq }
  0x14   : > { %444 = vset.pattern.permute.xlu0 %v507_v1  ;;  %366 = vmatprep.subr.mxu0 %v508_v2  ;;  %vm509_vm0 = vmmov 0   ;;  %v187_v5 = vld [vmem:[%s677_s1 + $0x60] sm:$0xff]  ;;  %v186_v7 = vld [vmem:[%s677_s1 + $0x58] sm:$0xff]  ;;  %v185_v8 = vld [vmem:[%s677_s1 + $0x50] sm:$0xff]  ;;  %v510_v22 = vmov 1.0   ;;  %vm262_vm2 = vcmask 261120  }
  0x15   : > { %367 = vmatpush3.msra.mxu0 %v190_v0  ;;  %398 = vmatprep.mubr.msk.f32.mxu0 %vm509_vm0, %v508_v2  ;;  %s342_s4 = sshll.u32 %s163_s28, 3  ;;  %v184_v9 = vld [vmem:[%s677_s1 + $0x48] sm:$0xff]  ;;  %v183_v10 = vld [vmem:[%s677_s1 + $0x40] sm:$0xff]  ;;  %v182_v11 = vld [vmem:[%s677_s1 + $0x38] sm:$0xff]  ;;  %v168_v20 = vand.u32 127, %v167_v19  ;;  %s511_s16 = smov [#allocation2]  }
  0x16   : > { %368 = vmatprep.subr.mxu0 %v508_v2  ;;  %s165_s7 = scalar_lea.vmem %s676_s0, %s342_s4  ;;  %v181_v12 = vld [vmem:[%s677_s1 + $0x30] sm:$0xff]  ;;  %v180_v13 = vld [vmem:[%s677_s1 + $0x28] sm:$0xff]  ;;  %v179_v14 = vld [vmem:[%s677_s1 + $0x20] sm:$0xff]  ;;  %s278_s4 = sshll.u32 %s161_s30, 4  ;;  %s279_s4 = int_to_ptr.vmem [resolvable:$true] %s278_s4 }
  0x17   : > { %369 = vmatpush3.msra.mxu0 %v189_v3  ;;  %v166_v6 = vld [vmem:[%s165_s7] sm:$0xff]  ;;  %v178_v15 = vld [vmem:[%s677_s1 + $0x18] sm:$0xff]  ;;  %v177_v16 = vld [vmem:[%s677_s1 + $0x10] sm:$0xff]  ;;  %s641_s7 = scalar_lea.hbm %s679_s3, %s346_s29  ;;  %s445_s9 = scalar_lea.vmem %s279_s4, 128 }
  0x18   : > { %370 = vmatprep.subr.mxu0 %v508_v2  ;;  %170 = vperm.xlu0 %444, %v166_v6   ;;  %v176_v17 = vld [vmem:[%s677_s1 + $0x8] sm:$0xff]  ;;  %v175_v18 = vld [vmem:[%s677_s1] sm:$0xff]  ;;  %p446_p11 = scmp.ne.s32.totalorder %s279_s4, %s445_s9  ;;  %s449_s10 = sshll.u32 %s511_s16, 4  ;;  %s450_s10 = int_to_ptr.vmem [resolvable:$false] %s449_s10 }
  0x19   : > { %371 = vmatpush3.msra.mxu0 %v188_v4  ;;  %v191_v23 = vld [vmem:[%s678_s2] sm:$0xff]  ;;  %s451_s11 = scalar_lea.vmem %s450_s10, 256  ;;  %p452_p0 = scmp.lt.s32.totalorder %s279_s4, %s450_s10 }
  0x1a   : > { %372 = vmatprep.subr.mxu0 %v508_v2  ;;  %p447_p12 = pnand %p446_p11, %p570_p5  ;;  %p453_p1 = scmp.lt.s32.totalorder %s451_s11, %s445_s9 }
  0x1b   : > { %373 = vmatpush3.msra.mxu0 %v187_v5 }
  0x1c   : > { %374 = vmatprep.subr.mxu0 %v508_v2  ;;  %p448_p13 = pneg %p447_p12  ;;  %p454_p2 = por %p453_p1, %p452_p0 }
  0x1d   : > { %375 = vmatpush3.msra.mxu0 %v186_v7 }
  0x1e   : > { %376 = vmatprep.subr.mxu0 %v508_v2  ;;  %p455_p3 = pnand %p454_p2, %p448_p13 }
  0x1f   : > { %377 = vmatpush3.msra.mxu0 %v185_v8 }
  0x20   : > { %378 = vmatprep.subr.mxu0 %v508_v2 }
  0x21   : > { %379 = vmatpush3.msra.mxu0 %v184_v9 }
  0x22   : > { %380 = vmatprep.subr.mxu0 %v508_v2 }
  0x23   : > { %381 = vmatpush3.msra.mxu0 %v183_v10 }
  0x24   : > { %382 = vmatprep.subr.mxu0 %v508_v2 }
  0x25   : > { %383 = vmatpush3.msra.mxu0 %v182_v11 }
  0x26   : > { %384 = vmatprep.subr.mxu0 %v508_v2 }
  0x27   : > { %385 = vmatpush3.msra.mxu0 %v181_v12 }
  0x28   : > { %386 = vmatprep.subr.mxu0 %v508_v2 }
  0x29   : > { %387 = vmatpush3.msra.mxu0 %v180_v13 }
  0x2a   : > { %388 = vmatprep.subr.mxu0 %v508_v2 }
  0x2b   : > { %389 = vmatpush3.msra.mxu0 %v179_v14 }
  0x2c   : > { %390 = vmatprep.subr.mxu0 %v508_v2 }
  0x2d   : > { %391 = vmatpush3.msra.mxu0 %v178_v15 }
  0x2e   : > { %392 = vmatprep.subr.mxu0 %v508_v2 }
  0x2f   : > { %393 = vmatpush3.msra.mxu0 %v177_v16 }
  0x30   : > { %394 = vmatprep.subr.mxu0 %v508_v2 }
  0x31   : > { %395 = vmatpush3.msra.mxu0 %v176_v17 }
  0x32   : > { %396 = vmatprep.subr.mxu0 %v508_v2 }
  0x33   : > { %397 = vmatpush3.msra.mxu0 %v175_v18 }
  0x93   : > { %v171_v21 = vpop.permute.xlu0 %170 }
  0x94   : > { %vm172_vm1 = vcmp.eq.s32.totalorder %v168_v20, %v171_v21 }
  0x95   : > { %399 = vmatmul.mubr.msk.f32.vlgmr.msra.gmra.mxu0 %vm172_vm1, %v510_v22 }
 0x155   : > { %v258_v24 = vpop.f32.mrf.mxu0 }
 0x156   : > { %v259_v25 = vadd.f32 %v258_v24, %v191_v23 }
 0x157   : > { %v400_v26 = vpop.f32.mrf.mxu0 }
 0x158   : > { %263 = vst.msk [vmem:[%s161_s30] sm:$0xff] %vm262_vm2, %v259_v25 }
 0x159   : > { %458 = shalt.err (!%p455_p3)
}
 0x15a   : > { %s459_s17 = scalar_lea.hbm %s641_s7, 128  ;;  %s463_s24 = scalar_lea.hbm %s679_s3, 256 }
 0x15b   : > { %p460_p4 = scmp.ne.s32.totalorder %s641_s7, %s459_s17  ;;  %p464_p9 = scmp.lt.s32.totalorder %s641_s7, %s679_s3 }
 0x15c   : > { %p465_p10 = scmp.lt.s32.totalorder %s463_s24, %s459_s17 }
 0x15d   : > { %p461_p7 = pnand %p460_p4, %p570_p5 }
 0x15e   : > { %p466_p11 = por %p465_p10, %p464_p9 }
 0x15f   : > { %p462_p8 = pneg %p461_p7 }
 0x161   : > { %p467_p12 = pnand %p466_p11, %p462_p8 }
 0x163   : > { %470 = shalt.err (!%p467_p12)
}
 0x164   : > { %401 = dma.vmem_to_hbm [thread:$0]  (%p570_p5), %s279_s4, 128, %s641_s7, %s265_s8  }
 0x165 PF: > { %p407_p13 = scmp.ge.s32.totalorder %s505_s15, 2  ;;  %s290_s27 = sand.u32 1, %s493_s12  }
 0x166   : > { %s291_s28 = scalar_lea.sflag [#allocation3], %s290_s27 }
 0x167   : > { %p404_p0 = pnand %p407_p13, %p574_p6 }
 0x169   : > { %p405_p1 = pneg %p404_p0 }
 0x16b   : > { %488 = dma.done.wait (%p405_p1), %s291_s28, 128  }
 0x16c   : > { %490 = vsyncadd (%p405_p1), %s291_s28, 4294967168  ;;  %p13_p2 = scmp.ge.s32.totalorder %s557_s18, 4   ;;  %s682_s12 = smov %s497_s13 }
 0x16d   : > { %s683_s13 = smov %s501_s14  ;;  %s684_s14 = smov %s568_s21 }
 0x16e   : > { %s685_s15 = smov %s557_s18  ;;  %15 = sbr.rel (!%p13_p2) target bundleno = 3 (0x3), region = 67 }
 0x173   :  { %296 = vsyncpa [#allocation3], 1 }
 0x174   :  { %298 = vsyncpa [#allocation3 + $0x1], 1 }

</bundles_post_ra>
